<compile_context>
chip_gen: v7x
topology: tpu7x:2x2x1
jax: 0.10.0
libtpu: 0.0.40
codegen_flags: <defaults>
</compile_context>

<pallas_src>
import functools

import jax
import jax.numpy as jnp
from jax import lax
from jax.experimental import pallas as pl
from jax.experimental.pallas import tpu as pltpu

# Deterministic "parameters" (match the module's __init__ fills).
W_IH = 1.0   # rnn.weight_ih_l0.data.fill_(1)
COEF = 0.97  # rnn.weight_hh_l0.data.fill_(self.coef)

_SUBLANES = 8        # f32 sublane depth: time steps per inner chunk
_LANES = 128
_DEF_T_TILE = 2048   # time samples per grid step (multiple of 128)


def _round_up(n, m):
    return ((n + m - 1) // m) * m


def _inv_preemphasis_kernel(x_ref, o_ref, h_ref, xt_ref, yt_ref, *, coef, w_ih):
    """One (B_TILE, T_TILE) tile of the tanh RNN recurrence.

    x_ref, o_ref : (B_TILE, T_TILE) VMEM tiles (lane-dense in T).
    h_ref        : (1, B_TILE) f32 hidden state, persists across the time grid.
    xt_ref/yt_ref: (T_TILE, B_TILE) f32 time-major staging scratch.
    """
    # New batch block -> reset hidden state (time is grid axis 1, innermost).
    @pl.when(pl.program_id(1) == 0)
    def _():
        h_ref[...] = jnp.zeros_like(h_ref)

    # Stage the tile time-major. The transpose runs on the XLU, which is idle
    # here (the serial tanh chain on the single EUP port is the floor).
    xt_ref[...] = jnp.transpose(x_ref[...].astype(jnp.float32))

    t_tile = xt_ref.shape[0]
    n_chunks = t_tile // _SUBLANES

    def chunk(c, h):
        base = pl.multiple_of(c * _SUBLANES, _SUBLANES)
        xc = xt_ref[pl.ds(base, _SUBLANES), :]           # one full (8, B) load
        rows = []
        for r in range(_SUBLANES):                       # 8 dependent tanh steps
            x_t = xc[r:r + 1, :]                         # (1, B)
            if w_ih != 1.0:                              # trace-time specialization
                x_t = w_ih * x_t
            h = jnp.tanh(x_t + coef * h)                 # RNN tanh cell, no bias
            rows.append(h)
        # One full (8, B) unmasked store instead of 8 single-sublane stores.
        yt_ref[pl.ds(base, _SUBLANES), :] = jnp.concatenate(rows, axis=0)
        return h

    h_ref[...] = lax.fori_loop(0, n_chunks, chunk, h_ref[...])

    # Back to (B_TILE, T_TILE): lane-dense output stores.
    o_ref[...] = jnp.transpose(yt_ref[...]).astype(o_ref.dtype)


def inverse_pre_emphasis(x, coef=COEF, w_ih=W_IH, t_tile=_DEF_T_TILE):
    """x: (B, 1, T) float -> (B, 1, T) float (matches the torch module)."""
    bsz, ch, t_len = x.shape
    assert ch == 1, "RNN(input_size=1) implies a single channel"
    dtype = x.dtype

    # Channel squeeze is free (C == 1); layout stays (B, T), lane-dense in T.
    x2 = x[:, 0, :]

    # Pad batch to the sublane depth and time to a lane-dense tile multiple.
    # Zero padding runs through the recurrence but is sliced off afterwards.
    t_tile = min(t_tile, _round_up(t_len, _LANES))
    b_pad = _round_up(bsz, _SUBLANES)
    t_pad = _round_up(t_len, t_tile)
    if (b_pad, t_pad) != (bsz, t_len):
        x2 = jnp.pad(x2, ((0, b_pad - bsz), (0, t_pad - t_len)))

    # Split the batch into blocks when large -> parallel axis feeds the two
    # TensorCores on v7x; harmless single block otherwise.
    b_tile = _LANES if (b_pad % _LANES == 0 and b_pad >= 2 * _LANES) else b_pad
    grid = (b_pad // b_tile, t_pad // t_tile)

    out = pl.pallas_call(
        functools.partial(_inv_preemphasis_kernel,
                          coef=float(coef), w_ih=float(w_ih)),
        out_shape=jax.ShapeDtypeStruct((b_pad, t_pad), dtype),
        grid_spec=pltpu.PrefetchScalarGridSpec(
            num_scalar_prefetch=0,
            grid=grid,
            in_specs=[pl.BlockSpec((b_tile, t_tile), lambda b, t: (b, t))],
            out_specs=pl.BlockSpec((b_tile, t_tile), lambda b, t: (b, t)),
            scratch_shapes=[
                pltpu.VMEM((1, b_tile), jnp.float32),       # hidden state carry
                pltpu.VMEM((t_tile, b_tile), jnp.float32),  # time-major input
                pltpu.VMEM((t_tile, b_tile), jnp.float32),  # time-major output
            ],
        ),
        compiler_params=pltpu.CompilerParams(
            dimension_semantics=("parallel", "arbitrary"),
        ),
        cost_estimate=pl.CostEstimate(
            flops=2 * b_pad * t_pad,
            transcendentals=b_pad * t_pad,
            bytes_accessed=2 * b_pad * t_pad * x.dtype.itemsize,
        ),
    )(x2)

    return out[:bsz, :t_len][:, None, :]


def _reference(x, coef=COEF, w_ih=W_IH):
    """Pure-JAX reference (lax.scan) for correctness checking."""
    xt = jnp.transpose(x[:, 0, :], (1, 0))  # (T, B)

    def step(h, x_t):
        h = jnp.tanh(w_ih * x_t + coef * h)
        return h, h

    h0 = jnp.zeros((xt.shape[1],), xt.dtype)
    _, ys = lax.scan(step, h0, xt)
    return jnp.transpose(ys, (1, 0))[:, None, :]


if __name__ == "__main__":
    key = jax.random.PRNGKey(0)

    # Small test matching the module's expected layout (B, C=1, T).
    B, C, T = 2, 1, 16
    x = jax.random.normal(key, (B, C, T), dtype=jnp.float32)
    y = inverse_pre_emphasis(x)
    jax.block_until_ready(y)
    y_ref = _reference(x)
    assert y.shape == (B, C, T)
    assert jnp.max(jnp.abs(y - y_ref)) < 1e-5

    # Second check exercising the hidden-state carry across multiple time tiles.
    B2, T2 = 3, 300
    x2 = jax.random.normal(jax.random.PRNGKey(0), (B2, 1, T2), dtype=jnp.float32)
    y2 = inverse_pre_emphasis(x2, t_tile=128)   # 3 time blocks of 128
    jax.block_until_ready(y2)
    y2_ref = _reference(x2)
    assert y2.shape == (B2, 1, T2)
    assert jnp.max(jnp.abs(y2 - y2_ref)) < 1e-5

    print("KERNEL_OK")
</pallas_src>

<mosaic_0001>
module attributes {stable_mosaic.version = 11 : i64} {
  func.func @_inv_preemphasis_kernel(%arg0: i32, %arg1: i32, %arg2: memref<8x128xf32, #tpu.memory_space<vmem>>, %arg3: memref<8x128xf32, #tpu.memory_space<vmem>>, %arg4: memref<1x8xf32, #tpu.memory_space<vmem>>, %arg5: memref<128x8xf32, #tpu.memory_space<vmem>>, %arg6: memref<128x8xf32, #tpu.memory_space<vmem>>) attributes {dimension_semantics = [#tpu.dimension_semantics<parallel>, #tpu.dimension_semantics<arbitrary>], iteration_bounds = array<i64: 1, 1>, scalar_prefetch = 0 : i64, scratch_operands = 3 : i64, tpu.core_type = #tpu.core_type<tc>, window_params = [{transform_indices = @transform_0, window_bounds = array<i64: 8, 128>}, {transform_indices = @transform_1, window_bounds = array<i64: 8, 128>}]} {
    %c0_i32 = arith.constant 0 : i32
    %0 = arith.cmpi eq, %arg1, %c0_i32 : i32
    %1 = arith.extui %0 : i1 to i32
    %c0_i32_0 = arith.constant 0 : i32
    %2 = arith.cmpi ne, %1, %c0_i32_0 : i32
    scf.if %2 {
      %cst = arith.constant 0.000000e+00 : f32
      %13 = vector.broadcast %cst : f32 to vector<1x8xf32>
      %c0_14 = arith.constant 0 : index
      %c0_15 = arith.constant 0 : index
      %14 = vector.load %arg4[%c0_14, %c0_15] : memref<1x8xf32, #tpu.memory_space<vmem>>, vector<1x8xf32>
      tpu.vector_store %arg4[%c0_14, %c0_15], %13 {strides = array<i32>} : memref<1x8xf32, #tpu.memory_space<vmem>>, vector<1x8xf32>,
    } else {
    }
    %c0 = arith.constant 0 : index
    %c0_1 = arith.constant 0 : index
    %3 = vector.load %arg2[%c0, %c0_1] : memref<8x128xf32, #tpu.memory_space<vmem>>, vector<8x128xf32>
    %4 = tpu.transpose %3, [1, 0] : vector<8x128xf32> -> vector<128x8xf32>
    %c0_2 = arith.constant 0 : index
    %c0_3 = arith.constant 0 : index
    %5 = vector.load %arg5[%c0_2, %c0_3] : memref<128x8xf32, #tpu.memory_space<vmem>>, vector<128x8xf32>
    tpu.vector_store %arg5[%c0_2, %c0_3], %4 {strides = array<i32>} : memref<128x8xf32, #tpu.memory_space<vmem>>, vector<128x8xf32>,
    %c0_4 = arith.constant 0 : index
    %c0_5 = arith.constant 0 : index
    %6 = vector.load %arg4[%c0_4, %c0_5] : memref<1x8xf32, #tpu.memory_space<vmem>>, vector<1x8xf32>
    %c0_i32_6 = arith.constant 0 : i32
    %c16_i32 = arith.constant 16 : i32
    %7 = arith.addi %c0_i32_6, %c16_i32 : i32
    %c1_i32 = arith.constant 1 : i32
    %8 = scf.for %arg7 = %c0_i32_6 to %7 step %c1_i32 iter_args(%arg8 = %6) -> (vector<1x8xf32>)  : i32 {
      %c8_i32 = arith.constant 8 : i32
      %13 = arith.muli %arg7, %c8_i32 : i32
      %14 = tpu.assume_multiple %13, 8 : i32
      %15 = arith.index_cast %14 : i32 to index
      %c0_14 = arith.constant 0 : index
      %16 = vector.load %arg5[%15, %c0_14] : memref<128x8xf32, #tpu.memory_space<vmem>>, vector<8x8xf32>
      %17 = vector.extract_strided_slice %16 {offsets = [0, 0], sizes = [1, 8], strides = [1, 1]} : vector<8x8xf32> to vector<1x8xf32>
      %cst = arith.constant 9.700000e-01 : f32
      %18 = vector.broadcast %cst : f32 to vector<1x8xf32>
      %19 = arith.mulf %18, %arg8 : vector<1x8xf32>
      %20 = arith.addf %17, %19 : vector<1x8xf32>
      %21 = math.tanh %20 : vector<1x8xf32>
      %22 = vector.extract_strided_slice %16 {offsets = [1, 0], sizes = [1, 8], strides = [1, 1]} : vector<8x8xf32> to vector<1x8xf32>
      %cst_15 = arith.constant 9.700000e-01 : f32
      %23 = vector.broadcast %cst_15 : f32 to vector<1x8xf32>
      %24 = arith.mulf %23, %21 : vector<1x8xf32>
      %25 = arith.addf %22, %24 : vector<1x8xf32>
      %26 = math.tanh %25 : vector<1x8xf32>
      %27 = vector.extract_strided_slice %16 {offsets = [2, 0], sizes = [1, 8], strides = [1, 1]} : vector<8x8xf32> to vector<1x8xf32>
      %cst_16 = arith.constant 9.700000e-01 : f32
      %28 = vector.broadcast %cst_16 : f32 to vector<1x8xf32>
      %29 = arith.mulf %28, %26 : vector<1x8xf32>
      %30 = arith.addf %27, %29 : vector<1x8xf32>
      %31 = math.tanh %30 : vector<1x8xf32>
      %32 = vector.extract_strided_slice %16 {offsets = [3, 0], sizes = [1, 8], strides = [1, 1]} : vector<8x8xf32> to vector<1x8xf32>
      %cst_17 = arith.constant 9.700000e-01 : f32
      %33 = vector.broadcast %cst_17 : f32 to vector<1x8xf32>
      %34 = arith.mulf %33, %31 : vector<1x8xf32>
      %35 = arith.addf %32, %34 : vector<1x8xf32>
      %36 = math.tanh %35 : vector<1x8xf32>
      %37 = vector.extract_strided_slice %16 {offsets = [4, 0], sizes = [1, 8], strides = [1, 1]} : vector<8x8xf32> to vector<1x8xf32>
      %cst_18 = arith.constant 9.700000e-01 : f32
      %38 = vector.broadcast %cst_18 : f32 to vector<1x8xf32>
      %39 = arith.mulf %38, %36 : vector<1x8xf32>
      %40 = arith.addf %37, %39 : vector<1x8xf32>
      %41 = math.tanh %40 : vector<1x8xf32>
      %42 = vector.extract_strided_slice %16 {offsets = [5, 0], sizes = [1, 8], strides = [1, 1]} : vector<8x8xf32> to vector<1x8xf32>
      %cst_19 = arith.constant 9.700000e-01 : f32
      %43 = vector.broadcast %cst_19 : f32 to vector<1x8xf32>
      %44 = arith.mulf %43, %41 : vector<1x8xf32>
      %45 = arith.addf %42, %44 : vector<1x8xf32>
      %46 = math.tanh %45 : vector<1x8xf32>
      %47 = vector.extract_strided_slice %16 {offsets = [6, 0], sizes = [1, 8], strides = [1, 1]} : vector<8x8xf32> to vector<1x8xf32>
      %cst_20 = arith.constant 9.700000e-01 : f32
      %48 = vector.broadcast %cst_20 : f32 to vector<1x8xf32>
      %49 = arith.mulf %48, %46 : vector<1x8xf32>
      %50 = arith.addf %47, %49 : vector<1x8xf32>
      %51 = math.tanh %50 : vector<1x8xf32>
      %52 = vector.extract_strided_slice %16 {offsets = [7, 0], sizes = [1, 8], strides = [1, 1]} : vector<8x8xf32> to vector<1x8xf32>
      %cst_21 = arith.constant 9.700000e-01 : f32
      %53 = vector.broadcast %cst_21 : f32 to vector<1x8xf32>
      %54 = arith.mulf %53, %51 : vector<1x8xf32>
      %55 = arith.addf %52, %54 : vector<1x8xf32>
      %56 = math.tanh %55 : vector<1x8xf32>
      %57 = tpu.concatenate %21, %26, %31, %36, %41, %46, %51, %56 in 0 : vector<1x8xf32>, vector<1x8xf32>, vector<1x8xf32>, vector<1x8xf32>, vector<1x8xf32>, vector<1x8xf32>, vector<1x8xf32>, vector<1x8xf32> -> vector<8x8xf32>
      %58 = arith.index_cast %14 : i32 to index
      %c0_22 = arith.constant 0 : index
      %59 = vector.load %arg6[%58, %c0_22] : memref<128x8xf32, #tpu.memory_space<vmem>>, vector<8x8xf32>
      tpu.vector_store %arg6[%58, %c0_22], %57 {strides = array<i32>} : memref<128x8xf32, #tpu.memory_space<vmem>>, vector<8x8xf32>,
      scf.yield %56 : vector<1x8xf32>
    }
    %c16_i32_7 = arith.constant 16 : i32
    %c0_8 = arith.constant 0 : index
    %c0_9 = arith.constant 0 : index
    %9 = vector.load %arg4[%c0_8, %c0_9] : memref<1x8xf32, #tpu.memory_space<vmem>>, vector<1x8xf32>
    tpu.vector_store %arg4[%c0_8, %c0_9], %8 {strides = array<i32>} : memref<1x8xf32, #tpu.memory_space<vmem>>, vector<1x8xf32>,
    %c0_10 = arith.constant 0 : index
    %c0_11 = arith.constant 0 : index
    %10 = vector.load %arg6[%c0_10, %c0_11] : memref<128x8xf32, #tpu.memory_space<vmem>>, vector<128x8xf32>
    %11 = tpu.transpose %10, [1, 0] : vector<128x8xf32> -> vector<8x128xf32>
    %c0_12 = arith.constant 0 : index
    %c0_13 = arith.constant 0 : index
    %12 = vector.load %arg3[%c0_12, %c0_13] : memref<8x128xf32, #tpu.memory_space<vmem>>, vector<8x128xf32>
    tpu.vector_store %arg3[%c0_12, %c0_13], %11 {strides = array<i32>} : memref<8x128xf32, #tpu.memory_space<vmem>>, vector<8x128xf32>,
    return
  }
  func.func @transform_0(%arg0: i32, %arg1: i32) -> (i32, i32) {
    %c0_i32 = arith.constant 0 : i32
    return %arg0, %arg1 : i32, i32
  }
  func.func @transform_1(%arg0: i32, %arg1: i32) -> (i32, i32) {
    %c0_i32 = arith.constant 0 : i32
    return %arg0, %arg1 : i32, i32
  }
}

</mosaic_0001>

<bundles_post_ra>
// kernel: tpu_custom_call.1
= control target key start
LH: loop header
LB: loop body
LE: loop exit
PB: predicated region body
PF: predicated region fallthrough
CT: control target
= control target key end

     0   :  { %6 = vsyncpa [#allocation6], 0  ;;  %s404_s0 = inlined_call_operand.hbm [shape: f32[8,128], index: 0, kind: input, shape index: {}]   ;;  %s405_s1 = inlined_call_operand.hbm [shape: f32[8,128], index: 1, kind: output, shape index: {}]  }
   0x1   :  { %7 = vsyncpa [#allocation7], 0  ;;  %s330_s6 = smov [#allocation5]   ;;  %s266_s10 = scalar_lea.hbm %s404_s0, 128 }
   0x2   :  { %s14_s7 = sshll.u32 %s330_s6, 4  ;;  %p267_p0 = scmp.ne.s32.totalorder %s404_s0, %s266_s10  ;;  %s15_s7 = int_to_ptr.vmem [resolvable:$true] %s14_s7 }
   0x3   :  { %p270_p1 = scmp.lt.u32.totalorder %s266_s10, %s404_s0 }
   0x5   :  { %p272_p2 = pnand %p270_p1, %p267_p0 }
   0x7   :  { %275 = shalt.err (!%p272_p2)
}
   0x8   :  { %s276_s15 = scalar_lea.vmem %s15_s7, 128  ;;  %p281_p4 = scmp.lt.s32.totalorder %s15_s7, %s15_s7 }
   0x9   :  { %p277_p3 = scmp.ne.s32.totalorder %s15_s7, %s276_s15  ;;  %p282_p5 = scmp.lt.s32.totalorder %s276_s15, %s276_s15 }
   0xb   :  { %p283_p6 = por %p282_p5, %p281_p4 }
   0xd   :  { %p284_p7 = pnand %p283_p6, %p277_p3 }
   0xf   :  { %287 = shalt.err (!%p284_p7)
}
  0x10   :  { %17 = dma.hbm_to_vmem [thread:$0]  %s404_s0, 128, %s15_s7, [#allocation6]  }
  0x11   :  { %318 = dma.done.wait [#allocation6], 128  }
  0x12   :  { %319 = vsyncadd [#allocation6], 4294967168  ;;  %vm25_vm0 = vcmask 57344   ;;  %v331_v0 = vmov 0.0   ;;  %v27_v1 = vld [vmem:[#allocation5] sm:$0xff]  ;;  %vm60_vm1 = vcmask 64512  }
  0x13   :  { %26 = vst.msk [vmem:[#allocation2] sm:$0x1] %vm25_vm0, %v331_v0  ;;  %28 = vxpose.xlu0.b32.start.end [1/1] (short) %v27_v1, 128  ;;  %s374_s0 = smov 0  }
  0x1a   :  { %v77_v2 = vld [vmem:[#allocation2] sm:$0x1]  }
  0x93   :  { %v44_v3 = vpop.trf.xlu0 }
  0x94   :  { %61 = vst.msk [vmem:[#allocation3] sm:$0xff] %vm60_vm1, %v44_v3 }
  0x97   :  { %v45_v4 = vpop.trf.xlu0 }
  0x98   :  { %62 = vst.msk [vmem:[#allocation3 + $0x8] sm:$0xff] %vm60_vm1, %v45_v4 }
  0x9b   :  { %v46_v5 = vpop.trf.xlu0 }
  0x9c   :  { %63 = vst.msk [vmem:[#allocation3 + $0x10] sm:$0xff] %vm60_vm1, %v46_v5 }
  0x9f   :  { %v47_v6 = vpop.trf.xlu0 }
  0xa0   :  { %64 = vst.msk [vmem:[#allocation3 + $0x18] sm:$0xff] %vm60_vm1, %v47_v6 }
  0xa3   :  { %v48_v7 = vpop.trf.xlu0 }
  0xa4   :  { %65 = vst.msk [vmem:[#allocation3 + $0x20] sm:$0xff] %vm60_vm1, %v48_v7 }
  0xa7   :  { %v49_v8 = vpop.trf.xlu0 }
  0xa8   :  { %66 = vst.msk [vmem:[#allocation3 + $0x28] sm:$0xff] %vm60_vm1, %v49_v8 }
  0xab   :  { %v50_v9 = vpop.trf.xlu0 }
  0xac   :  { %67 = vst.msk [vmem:[#allocation3 + $0x30] sm:$0xff] %vm60_vm1, %v50_v9 }
  0xaf   :  { %v51_v10 = vpop.trf.xlu0 }
  0xb0   :  { %68 = vst.msk [vmem:[#allocation3 + $0x38] sm:$0xff] %vm60_vm1, %v51_v10 }
  0xb3   :  { %v52_v11 = vpop.trf.xlu0 }
  0xb4   :  { %69 = vst.msk [vmem:[#allocation3 + $0x40] sm:$0xff] %vm60_vm1, %v52_v11 }
  0xb7   :  { %v53_v12 = vpop.trf.xlu0 }
  0xb8   :  { %70 = vst.msk [vmem:[#allocation3 + $0x48] sm:$0xff] %vm60_vm1, %v53_v12 }
  0xbb   :  { %v54_v13 = vpop.trf.xlu0 }
  0xbc   :  { %71 = vst.msk [vmem:[#allocation3 + $0x50] sm:$0xff] %vm60_vm1, %v54_v13 }
  0xbf   :  { %v55_v14 = vpop.trf.xlu0 }
  0xc0   :  { %72 = vst.msk [vmem:[#allocation3 + $0x58] sm:$0xff] %vm60_vm1, %v55_v14 }
  0xc3   :  { %v56_v15 = vpop.trf.xlu0 }
  0xc4   :  { %73 = vst.msk [vmem:[#allocation3 + $0x60] sm:$0xff] %vm60_vm1, %v56_v15 }
  0xc7   :  { %v57_v16 = vpop.trf.xlu0 }
  0xc8   :  { %74 = vst.msk [vmem:[#allocation3 + $0x68] sm:$0xff] %vm60_vm1, %v57_v16 }
  0xcb   :  { %v58_v17 = vpop.trf.xlu0 }
  0xcc   :  { %75 = vst.msk [vmem:[#allocation3 + $0x70] sm:$0xff] %vm60_vm1, %v58_v17 }
  0xcf   :  { %v59_v18 = vpop.trf.xlu0 }
  0xd0   :  { %76 = vst.msk [vmem:[#allocation3 + $0x78] sm:$0xff] %vm60_vm1, %v59_v18 }
  0xd1 LB: > { %s230_s18 = sshll.u32 %s328_s0, 3  ;;  %v88_v19 = vmul.f32 0.97, %v324_v2  ;;  %vm133_vm2 = vcmask 1040384   ;;  %vm135_vm3 = vcmask 1041408   ;;  %vm137_vm4 = vcmask 1042432   ;;  %s328_s0 = sphi %s374_s0, %s83_s0   ;;  %v324_v2 = vphi %v77_v2, %v406_v2  }
  0xd2   : > { %s86_s19 = scalar_lea.vmem [#allocation3], %s230_s18  ;;  %vm139_vm5 = vcmask 1043456   ;;  %vm141_vm6 = vcmask 1044480   ;;  %vm143_vm7 = vcmask 1045504   ;;  %vm145_vm8 = vcmask 1046528   ;;  %s147_s20 = scalar_lea.vmem [#allocation4], %s230_s18 }
  0xd3   : > { %s83_s0 = sadd.s32 1, %s328_s0  }
  0xd4   : > { %p80_p8 = scmp.ge.s32.totalorder %s83_s0, 16  }
  0xd5   :  { %s332_s21 = smov (%p80_p8), [#allocation8]  }
  0xd6   :  { %s209_s22 = sshll.u32 (%p80_p8), %s332_s21, 4  ;;  %s210_s22 = int_to_ptr.vmem [resolvable:$true] %s209_s22 }
  0xd7   : > { %v87_v20 = vld [vmem:[%s86_s19] sm:$0xff]  ;;  %s288_s23 = scalar_lea.vmem (%p80_p8), %s210_s22, 128  ;;  %p293_p10 = scmp.lt.s32.totalorder (%p80_p8), %s210_s22, %s210_s22 }
  0xd8   : > { %v89_v21 = vadd.f32 %v88_v19, %v87_v20  ;;  %p289_p9 = scmp.ne.s32.totalorder (%p80_p8), %s210_s22, %s288_s23  ;;  %p294_p11 = scmp.lt.s32.totalorder (%p80_p8), %s288_s23, %s288_s23 }
  0xda   : > { %250 = vtanh.f32 %v89_v21  ;;  %p295_p12 = por (%p80_p8), %p294_p11, %p293_p10 }
  0xdc   :  { %p296_p13 = pnand (%p80_p8), %p295_p12, %p289_p9 }
  0xe4   : > { %v251_v22 = vpop.eup %250 }
  0xe5   : > { %v91_v23 = vmul.f32 0.97, %v251_v22 }
  0xe7   : > { %v93_v24 = vrot.slane %v91_v23, 7 }
  0xe9   : > { %v95_v25 = vadd.f32 %v93_v24, %v87_v20 }
  0xeb   : > { %252 = vtanh.f32 %v95_v25 }
  0xf5   : > { %v253_v26 = vpop.eup %252 }
  0xf6   : > { %v97_v27 = vmul.f32 0.97, %v253_v26  ;;  %v134_v28 = vsel %vm133_vm2, %v251_v22, %v253_v26 }
  0xf8   : > { %v99_v29 = vrot.slane %v97_v27, 7 }
  0xfa   : > { %v101_v30 = vadd.f32 %v99_v29, %v87_v20 }
  0xfc   : > { %254 = vtanh.f32 %v101_v30 }
 0x106   : > { %v255_v31 = vpop.eup %254 }
 0x107   : > { %v103_v32 = vmul.f32 0.97, %v255_v31  ;;  %v136_v33 = vsel %vm135_vm3, %v134_v28, %v255_v31 }
 0x109   : > { %v105_v34 = vrot.slane %v103_v32, 7 }
 0x10b   : > { %v107_v35 = vadd.f32 %v105_v34, %v87_v20 }
 0x10d   : > { %256 = vtanh.f32 %v107_v35 }
 0x117   : > { %v257_v36 = vpop.eup %256 }
 0x118   : > { %v109_v37 = vmul.f32 0.97, %v257_v36  ;;  %v138_v38 = vsel %vm137_vm4, %v136_v33, %v257_v36 }
 0x11a   : > { %v111_v39 = vrot.slane %v109_v37, 7 }
 0x11c   : > { %v113_v40 = vadd.f32 %v111_v39, %v87_v20 }
 0x11e   : > { %258 = vtanh.f32 %v113_v40 }
 0x128   : > { %v259_v41 = vpop.eup %258 }
 0x129   : > { %v115_v42 = vmul.f32 0.97, %v259_v41  ;;  %v140_v53 = vsel %vm139_vm5, %v138_v38, %v259_v41 }
 0x12b   : > { %v117_v43 = vrot.slane %v115_v42, 7 }
 0x12d   : > { %v119_v44 = vadd.f32 %v117_v43, %v87_v20 }
 0x12f   : > { %260 = vtanh.f32 %v119_v44 }
 0x139   : > { %v261_v45 = vpop.eup %260 }
 0x13a   : > { %v121_v46 = vmul.f32 0.97, %v261_v45  ;;  %v142_v54 = vsel %vm141_vm6, %v140_v53, %v261_v45 }
 0x13c   : > { %v123_v47 = vrot.slane %v121_v46, 7 }
 0x13e   : > { %v125_v48 = vadd.f32 %v123_v47, %v87_v20 }
 0x140   : > { %262 = vtanh.f32 %v125_v48 }
 0x14a   : > { %v263_v49 = vpop.eup %262 }
 0x14b   : > { %v127_v50 = vmul.f32 0.97, %v263_v49  ;;  %v144_v55 = vsel %vm143_vm7, %v142_v54, %v263_v49 }
 0x14d   : > { %v129_v51 = vrot.slane %v127_v50, 7 }
 0x14f   : > { %v131_v52 = vadd.f32 %v129_v51, %v87_v20 }
 0x151   : > { %264 = vtanh.f32 %v131_v52 }
 0x158   :  { %82 = sbr.rel (!%p80_p8) target bundleno = 209 (0xd1), region = 41 }
 0x15b   : > { %v265_v56 = vpop.eup %264 }
 0x15c   : > { %v146_v57 = vsel %vm145_vm8, %v144_v55, %v265_v56  ;;  %v150_v58 = vrot.slane %v265_v56, 7  }
 0x15d   : > { %148 = vst.msk [vmem:[%s147_s20] sm:$0xff] %vm60_vm1, %v146_v57 }
 0x15e   : > { %v406_v2 = vmov %v150_v58  ;;  %153 = vst.msk [vmem:[#allocation2] sm:$0x1] (%p80_p8), %vm25_vm0, %v150_v58 }
 0x164   :  { %v154_v59 = vld [vmem:[#allocation4] sm:$0xff]  ;;  %v155_v60 = vld [vmem:[#allocation4 + $0x8] sm:$0xff]  ;;  %v156_v61 = vld [vmem:[#allocation4 + $0x10] sm:$0xff] }
 0x165   :  { %170 = vxpose.xlu0.b32.start [1/16] (narrow) %v154_v59, 8  ;;  %v157_v62 = vld [vmem:[#allocation4 + $0x18] sm:$0xff]  ;;  %v158_v63 = vld [vmem:[#allocation4 + $0x20] sm:$0xff]  ;;  %v159_v0 = vld [vmem:[#allocation4 + $0x28] sm:$0xff] }
 0x166   :  { %v160_v1 = vld [vmem:[#allocation4 + $0x30] sm:$0xff]  ;;  %v161_v2 = vld [vmem:[#allocation4 + $0x38] sm:$0xff]  ;;  %v162_v3 = vld [vmem:[#allocation4 + $0x40] sm:$0xff] }
 0x167   :  { %v163_v4 = vld [vmem:[#allocation4 + $0x48] sm:$0xff]  ;;  %v164_v5 = vld [vmem:[#allocation4 + $0x50] sm:$0xff]  ;;  %v165_v6 = vld [vmem:[#allocation4 + $0x58] sm:$0xff] }
 0x168   :  { %v166_v7 = vld [vmem:[#allocation4 + $0x60] sm:$0xff]  ;;  %v167_v8 = vld [vmem:[#allocation4 + $0x68] sm:$0xff]  ;;  %v168_v9 = vld [vmem:[#allocation4 + $0x70] sm:$0xff] }
 0x169   :  { %171 = vxpose.xlu0.b32.cont [2/16] (narrow) %v155_v60, 8  ;;  %v169_v10 = vld [vmem:[#allocation4 + $0x78] sm:$0xff] }
 0x16d   :  { %172 = vxpose.xlu0.b32.cont [3/16] (narrow) %v156_v61, 8 }
 0x171   :  { %173 = vxpose.xlu0.b32.cont [4/16] (narrow) %v157_v62, 8 }
 0x175   :  { %174 = vxpose.xlu0.b32.cont [5/16] (narrow) %v158_v63, 8 }
 0x179   :  { %175 = vxpose.xlu0.b32.cont [6/16] (narrow) %v159_v0, 8 }
 0x17d   :  { %176 = vxpose.xlu0.b32.cont [7/16] (narrow) %v160_v1, 8 }
 0x181   :  { %177 = vxpose.xlu0.b32.cont [8/16] (narrow) %v161_v2, 8 }
 0x185   :  { %178 = vxpose.xlu0.b32.cont [9/16] (narrow) %v162_v3, 8 }
 0x189   :  { %179 = vxpose.xlu0.b32.cont [10/16] (narrow) %v163_v4, 8 }
 0x18d   :  { %180 = vxpose.xlu0.b32.cont [11/16] (narrow) %v164_v5, 8 }
 0x191   :  { %181 = vxpose.xlu0.b32.cont [12/16] (narrow) %v165_v6, 8 }
 0x195   :  { %182 = vxpose.xlu0.b32.cont [13/16] (narrow) %v166_v7, 8 }
 0x199   :  { %183 = vxpose.xlu0.b32.cont [14/16] (narrow) %v167_v8, 8 }
 0x19d   :  { %184 = vxpose.xlu0.b32.cont [15/16] (narrow) %v168_v9, 8 }
 0x1a1   :  { %185 = vxpose.xlu0.b32.end [16/16] (narrow) %v169_v10, 8 }
 0x1e5   :  { %v186_v11 = vpop.trf.xlu0 }
 0x1e6   :  { %202 = vst [vmem:[#allocation8] sm:$0xff] %v186_v11 }
 0x1e7   :  { %299 = shalt.err (!%p296_p13)
}
 0x1e8   :  { %s300_s26 = scalar_lea.hbm %s405_s1, 128 }
 0x1e9   :  { %p301_p0 = scmp.ne.s32.totalorder %s405_s1, %s300_s26  ;;  %p304_p1 = scmp.lt.u32.totalorder %s300_s26, %s405_s1 }
 0x1eb   :  { %p306_p2 = pnand %p304_p1, %p301_p0 }
 0x1ed   :  { %309 = shalt.err (!%p306_p2)
}
 0x1ee   :  { %212 = dma.vmem_to_hbm [thread:$0]  %s210_s22, 128, %s405_s1, [#allocation7]  }
 0x1ef   :  { %320 = dma.done.wait [#allocation7], 128  }
 0x1f0   :  { %321 = vsyncadd [#allocation7], 4294967168 }
 0x1f1   :  { %216 = vsyncpa [#allocation6], 1 }
 0x1f2   :  { %217 = vsyncpa [#allocation7], 1 }

</bundles_post_ra>
